<compile_context>
chip_gen: v5e
topology: v5e:2x2
jax: 0.10.0
libtpu: 0.0.40
codegen_flags: <defaults>
</compile_context>

<pallas_src>
import jax
import jax.numpy as jnp
from jax.experimental import pallas as pl
from jax.experimental.pallas import tpu as pltpu


def identity_copy_kernel(x_ref, o_ref):
    # Straight pass-through of the current lane-dense tile.
    o_ref[...] = x_ref[...]


_SMALL_BYTES = 1 << 20  # below this, a pallas_call is pure dispatch overhead


def _lane_dense_2d(total_elems):
    """Pick (rows, lanes) with lanes a multiple of 128 (widest <= 8192)."""
    for lanes in (8192, 4096, 2048, 1024, 512, 256, 128):
        if total_elems % lanes == 0:
            return total_elems // lanes, lanes
    return None


def _identity_pallas_2d(x2d):
    R, L = x2d.shape
    itemsize = jnp.dtype(x2d.dtype).itemsize

    if R >= 8:
        # ~8 MiB per tile: double-buffered input + output = 4 tiles = 32 MiB,
        # within the explicit 48 MiB VMEM limit below (v7x physical 64 MiB).
        tile_bytes_cap = 8 * 1024 * 1024
        max_rows = max(8, tile_bytes_cap // (L * itemsize))
        tr = min((R // 8) * 8, (max_rows // 8) * 8)
        if R >= 16:
            # Keep at least 2 grid steps: enables software pipelining and lets
            # the "parallel" axis split rows across v7x's two TensorCores.
            half = max(8, ((R // 2) // 8) * 8)
            tr = min(tr, half)
        tr = max(tr, 8)
    else:
        # Tiny row extent: block equals the full array extent (always legal).
        tr = R

    grid = (pl.cdiv(R, tr),)

    return pl.pallas_call(
        identity_copy_kernel,
        out_shape=jax.ShapeDtypeStruct((R, L), x2d.dtype),
        grid=grid,
        in_specs=[pl.BlockSpec((tr, L), lambda i: (i, 0))],
        out_specs=pl.BlockSpec((tr, L), lambda i: (i, 0)),
        # No input_output_aliases: alias-then-reuse forces a hidden XLA copy.
        compiler_params=pltpu.CompilerParams(
            dimension_semantics=("parallel",),
            vmem_limit_bytes=48 * 1024 * 1024,
        ),
    )(x2d)


def materialized_identity(x, *, force_pallas=False):
    """Identity that returns a materialized buffer.

    Only used when a fresh copy is explicitly required; small or
    non-128-divisible tensors take the plain XLA path (no kernel launch).
    """
    nbytes = x.size * jnp.dtype(x.dtype).itemsize
    layout = _lane_dense_2d(x.size)
    if layout is None or (nbytes < _SMALL_BYTES and not force_pallas):
        # Plain XLA copy / no-op: strictly cheaper than an opaque pallas_call.
        return jnp.asarray(x)
    R, L = layout
    # Contiguous (row-major) reshape: a pure view, no relayout/extra copy.
    return _identity_pallas_2d(x.reshape(R, L)).reshape(x.shape)


def my_custom_model_forward(x):
    """Pallas-project implementation of MyCustomModel.forward (identity).

    The operation is zero-FLOP and zero-byte, so the optimal implementation on
    every TPU generation is simply to return the input unchanged.
    """
    return x


if __name__ == "__main__":
    key = jax.random.PRNGKey(0)
    # MyCustomModel has no parameters (num_classes unused); forward is identity.
    x = jax.random.normal(key, (2, 4, 16, 16), dtype=jnp.float32)

    # Fast path: the forward pass itself never touches HBM.
    y = my_custom_model_forward(x)
    y = jax.block_until_ready(y)
    assert y.shape == x.shape
    assert y.dtype == x.dtype
    assert jnp.array_equal(y, x)

    # Exercise the Pallas copy kernel once as a correctness smoke test (the
    # default forward never launches it, and materialized_identity would skip
    # it anyway for an 8 KiB tensor without force_pallas=True).
    y2 = materialized_identity(x, force_pallas=True)
    y2 = jax.block_until_ready(y2)
    assert y2.shape == x.shape
    assert y2.dtype == x.dtype
    assert jnp.array_equal(y2, x)

    print("KERNEL_OK")
</pallas_src>

<mosaic_0001>
module attributes {stable_mosaic.version = 11 : i64} {
  func.func @identity_copy_kernel(%arg0: i32, %arg1: memref<1x2048xf32, #tpu.memory_space<vmem>>, %arg2: memref<1x2048xf32, #tpu.memory_space<vmem>>) attributes {dimension_semantics = [#tpu.dimension_semantics<parallel>], iteration_bounds = array<i64: 1>, scalar_prefetch = 0 : i64, scratch_operands = 0 : i64, tpu.core_type = #tpu.core_type<tc>, window_params = [{transform_indices = @transform_0, window_bounds = array<i64: 1, 2048>}, {transform_indices = @transform_1, window_bounds = array<i64: 1, 2048>}]} {
    %c0 = arith.constant 0 : index
    %c0_0 = arith.constant 0 : index
    %0 = vector.load %arg1[%c0, %c0_0] : memref<1x2048xf32, #tpu.memory_space<vmem>>, vector<1x2048xf32>
    %c0_1 = arith.constant 0 : index
    %c0_2 = arith.constant 0 : index
    %1 = vector.load %arg2[%c0_1, %c0_2] : memref<1x2048xf32, #tpu.memory_space<vmem>>, vector<1x2048xf32>
    tpu.vector_store %arg2[%c0_1, %c0_2], %0 {strides = array<i32>} : memref<1x2048xf32, #tpu.memory_space<vmem>>, vector<1x2048xf32>,
    return
  }
  func.func @transform_0(%arg0: i32) -> (i32, i32) {
    %c0_i32 = arith.constant 0 : i32
    %c0_i32_0 = arith.constant 0 : i32
    return %arg0, %c0_i32 : i32, i32
  }
  func.func @transform_1(%arg0: i32) -> (i32, i32) {
    %c0_i32 = arith.constant 0 : i32
    %c0_i32_0 = arith.constant 0 : i32
    return %arg0, %c0_i32 : i32, i32
  }
}

</mosaic_0001>

<bundles_post_ra>
// kernel: tpu_custom_call.1
= control target key start
LH: loop header
LB: loop body
LE: loop exit
PB: predicated region body
PF: predicated region fallthrough
CT: control target
= control target key end

     0   :  { %6 = vsyncpa [#allocation3], 0  ;;  %s116_s0 = inlined_call_operand.hbm [shape: f32[1,2048], index: 0, kind: input, shape index: {}]   ;;  %s117_s1 = inlined_call_operand.hbm [shape: f32[1,2048], index: 1, kind: output, shape index: {}]  }
   0x1   :  { %7 = vsyncpa [#allocation4], 0  ;;  %s13_s8 = sshll.u32 %s116_s0, 4  ;;  %s98_s9 = smov [#allocation2]   ;;  %s14_s8 = int_to_ptr.hbm [resolvable:$true] %s13_s8 }
   0x2   :  { %s15_s10 = sshll.u32 %s98_s9, 4  ;;  %s16_s10 = int_to_ptr.vmem [resolvable:$true] %s15_s10 }
   0x3   :  { %18 = dma.hbm_to_vmem [thread:$0]  %s14_s8, 256, %s16_s10, [#allocation3]  }
   0x4   :  { %94 = dma.done.wait [#allocation3], 256  }
   0x5   :  { %95 = vsyncadd [#allocation3], 4294967040  ;;  %s99_s11 = smov [#allocation5]   ;;  %s34_s15 = sshll.u32 %s117_s1, 4  ;;  %v23_v0 = vld [vmem:[#allocation2] sm:$0xff]  ;;  %v24_v1 = vld [vmem:[#allocation2 + $0x8] sm:$0xff]  ;;  %s35_s15 = int_to_ptr.hbm [resolvable:$true] %s34_s15 }
   0x6   :  { %s32_s12 = sshll.u32 %s99_s11, 4  ;;  %25 = vst [vmem:[#allocation5] sm:$0xff] %v23_v0  ;;  %s33_s12 = int_to_ptr.vmem [resolvable:$true] %s32_s12 }
   0x7   :  { %26 = vst [vmem:[#allocation5 + $0x8] sm:$0xff] %v24_v1 }
   0x8   :  { %37 = dma.vmem_to_hbm [thread:$0]  %s33_s12, 256, %s35_s15, [#allocation4]  }
   0x9   :  { %96 = dma.done.wait [#allocation4], 256  }
   0xa   :  { %97 = vsyncadd [#allocation4], 4294967040 }
   0xb   :  { %42 = vsyncpa [#allocation3], 1 }
   0xc   :  { %43 = vsyncpa [#allocation4], 1 }

</bundles_post_ra>
